<compile_context>
chip_gen: v5e
topology: v5e:2x2
jax: 0.10.0
libtpu: 0.0.40
codegen_flags: <defaults>
</compile_context>

<pallas_src>
import functools

import jax
import jax.numpy as jnp
from jax.experimental import pallas as pl
from jax.experimental.pallas import tpu as pltpu


def _dws_kernel(x_ref, top_ref, bot_ref, dw_ref, pw_ref, pb_ref, o_ref, work_ref,
                *, TH, W, C_in, C_out):
    # x_ref:   (1, C_in, TH*W)   row tile, spatial flattened (lanes)
    # top_ref: (1, 1, C_in, W)   row above the tile (zeros at image top)
    # bot_ref: (1, 1, C_in, W)   row below the tile (zeros at image bottom)
    # dw_ref:  (C_in, 9)         depthwise taps, column k = ky*3+kx
    # pw_ref:  (C_out, C_in)     pointwise weights
    # pb_ref:  (C_out, 1)        pointwise bias with depthwise bias folded in
    # o_ref:   (1, C_out, TH*W)
    # work_ref:(C_in, TH*W + 2*(W+1))  f32 haloed working buffer (VMEM scratch)
    TPW = TH * W
    hp = W + 1  # halo padding on each end of the working buffer

    # In-kernel "padding": stage tile + one-row halos into one f32 buffer.
    # (single cast here; the nine taps below read f32 directly)
    work_ref[:, hp - W:hp] = top_ref[0, 0].astype(jnp.float32)
    work_ref[:, hp:hp + TPW] = x_ref[0].astype(jnp.float32)
    work_ref[:, hp + TPW:hp + TPW + W] = bot_ref[0, 0].astype(jnp.float32)

    # Column-validity masks for the horizontal +/-1 taps (zero padding along W).
    col = jax.lax.broadcasted_iota(jnp.int32, (C_in, TPW), 1) % W
    not_first_col = col >= 1        # tap reads column j-1
    not_last_col = col <= W - 2     # tap reads column j+1

    # Depthwise 3x3: nine multiply-accumulates over statically offset views of
    # the haloed buffer; per-channel weights broadcast along the lane dim.
    acc = jnp.zeros((C_in, TPW), dtype=jnp.float32)
    for dy in range(3):
        for dx in range(3):
            k = dy * 3 + dx
            off = hp + (dy - 1) * W + (dx - 1)
            w_col = dw_ref[:, k:k + 1]                      # (C_in, 1)
            contrib = work_ref[:, off:off + TPW] * w_col    # (C_in, TH*W)
            if dx == 0:
                contrib = jnp.where(not_first_col, contrib, 0.0)
            elif dx == 2:
                contrib = jnp.where(not_last_col, contrib, 0.0)
            acc = acc + contrib

    # Pointwise 1x1 conv == (C_out, C_in) @ (C_in, TH*W) matmul on the MXU.
    # Depthwise bias is pre-folded into pb_ref (the pointwise conv is linear).
    y = jnp.dot(pw_ref[...], acc, preferred_element_type=jnp.float32)
    y = y + pb_ref[...]
    o_ref[0] = y.astype(o_ref.dtype)


def _pick_tile_rows(H, W, C_in, C_out, itemsize, budget_bytes=12 << 20):
    """Largest divisor TH of H whose flattened tile (TH*W) is a multiple of 128
    (lane-dense blocks/stores) and whose double-buffered tiles fit the VMEM
    budget, preferring >=2 row tiles so both v7x TensorCores get work."""
    def tile_bytes(th):
        tpw = th * W
        return (2 * (C_in * tpw + 2 * C_in * W) * itemsize   # in bufs (x + halos)
                + 2 * C_out * tpw * itemsize                  # out bufs
                + C_in * (tpw + 2 * (W + 1)) * 4)             # f32 work scratch

    divisors = [d for d in range(1, H + 1) if H % d == 0]
    ok = [d for d in divisors
          if (d * W) % 128 == 0 and tile_bytes(d) <= budget_bytes]
    if not ok:
        return H  # whole image per program (blocks equal full array dims)
    multi = [d for d in ok if H // d >= 2]
    return max(multi) if multi else max(ok)


def depthwise_separable_conv(x, dw, db, pw, pb):
    """x: (N, C_in, H, W); dw: (C_in,1,3,3); db: (C_in,);
       pw: (C_out, C_in, 1, 1); pb: (C_out,).  Returns (N, C_out, H, W)."""
    N, C_in, H, W = x.shape
    C_out = pw.shape[0]
    TH = _pick_tile_rows(H, W, C_in, C_out, x.dtype.itemsize)
    nt = H // TH
    TPW = TH * W

    # ---- wrapper prep: NO transposes of x and NO full pad pass over HBM ----
    x_flat = x.reshape(N, C_in, H * W)                 # free: contiguous reshape

    # One-row halos per row tile (zeros at the top/bottom image border).
    zrow = jnp.zeros((N, C_in, 1, W), x.dtype)
    top_rows = x[:, :, TH - 1:H - 1:TH, :]             # rows t*TH - 1, t >= 1
    bot_rows = x[:, :, TH::TH, :]                      # rows (t+1)*TH, t < nt-1
    tops = jnp.transpose(jnp.concatenate([zrow, top_rows], axis=2), (0, 2, 1, 3))
    bots = jnp.transpose(jnp.concatenate([bot_rows, zrow], axis=2), (0, 2, 1, 3))

    # Parameters: depthwise taps as (C_in, 9) columns, pointwise as a matrix,
    # depthwise bias folded into the pointwise bias (pointwise is linear).
    dw_mat = dw[:, 0].reshape(C_in, 9).astype(jnp.float32)
    pw_mat = pw[:, :, 0, 0].astype(jnp.float32)        # (C_out, C_in)
    pb_eff = (pb.astype(jnp.float32)
              + pw_mat @ db.astype(jnp.float32)).reshape(C_out, 1)

    kernel = functools.partial(_dws_kernel, TH=TH, W=W, C_in=C_in, C_out=C_out)

    # Explicit scoped-VMEM limit sized from the actual tiles (never below the
    # 32 MiB default; capped under v7x's 64 MiB physical VMEM for headroom).
    est = (2 * (C_in * TPW + 2 * C_in * W) * x.dtype.itemsize
           + 2 * C_out * TPW * x.dtype.itemsize
           + C_in * (TPW + 2 * (W + 1)) * 4)
    vmem_limit = int(min(48 << 20, max(32 << 20, 4 * est)))

    out_flat = pl.pallas_call(
        kernel,
        out_shape=jax.ShapeDtypeStruct((N, C_out, H * W), x.dtype),
        grid_spec=pltpu.PrefetchScalarGridSpec(
            num_scalar_prefetch=0,
            grid=(N, nt),                               # batch x row-tiles
            in_specs=[
                pl.BlockSpec((1, C_in, TPW), lambda n, t: (n, 0, t)),
                pl.BlockSpec((1, 1, C_in, W), lambda n, t: (n, t, 0, 0)),
                pl.BlockSpec((1, 1, C_in, W), lambda n, t: (n, t, 0, 0)),
                pl.BlockSpec((C_in, 9), lambda n, t: (0, 0)),
                pl.BlockSpec((C_out, C_in), lambda n, t: (0, 0)),
                pl.BlockSpec((C_out, 1), lambda n, t: (0, 0)),
            ],
            out_specs=pl.BlockSpec((1, C_out, TPW), lambda n, t: (n, 0, t)),
            scratch_shapes=[pltpu.VMEM((C_in, TPW + 2 * (W + 1)), jnp.float32)],
        ),
        compiler_params=pltpu.CompilerParams(
            dimension_semantics=("parallel", "parallel"),
            vmem_limit_bytes=vmem_limit,
        ),
    )(x_flat, tops, bots, dw_mat, pw_mat, pb_eff)

    return out_flat.reshape(N, C_out, H, W)


def reference_nchw(x, dw, db, pw, pb):
    """Pure-JAX reference matching nn.Conv2d semantics (for verification)."""
    C_in = dw.shape[0]
    y = jax.lax.conv_general_dilated(
        x, dw, window_strides=(1, 1), padding=((1, 1), (1, 1)),
        dimension_numbers=("NCHW", "OIHW", "NCHW"), feature_group_count=C_in)
    y = y + db.reshape(1, -1, 1, 1)
    z = jax.lax.conv_general_dilated(
        y, pw, window_strides=(1, 1), padding="VALID",
        dimension_numbers=("NCHW", "OIHW", "NCHW"))
    z = z + pb.reshape(1, -1, 1, 1)
    return z


if __name__ == "__main__":
    N, C_in, C_out, H, W = 2, 4, 8, 16, 16

    key = jax.random.PRNGKey(0)
    k_x, k_dw, k_db, k_pw, k_pb = jax.random.split(key, 5)

    # Deterministic parameter init (PyTorch Conv2d-style uniform bounds).
    x = jax.random.normal(k_x, (N, C_in, H, W), dtype=jnp.float32)

    dw_bound = 1.0 / (1 * 3 * 3) ** 0.5  # depthwise fan_in = 1*3*3
    dw = jax.random.uniform(k_dw, (C_in, 1, 3, 3), jnp.float32, -dw_bound, dw_bound)
    db = jax.random.uniform(k_db, (C_in,), jnp.float32, -dw_bound, dw_bound)

    pw_bound = 1.0 / (C_in * 1 * 1) ** 0.5  # pointwise fan_in = C_in
    pw = jax.random.uniform(k_pw, (C_out, C_in, 1, 1), jnp.float32, -pw_bound, pw_bound)
    pb = jax.random.uniform(k_pb, (C_out,), jnp.float32, -pw_bound, pw_bound)

    out = depthwise_separable_conv(x, dw, db, pw, pb)
    out = jax.block_until_ready(out)

    ref = jax.block_until_ready(reference_nchw(x, dw, db, pw, pb))
    assert out.shape == (N, C_out, H, W)
    assert jnp.allclose(out, ref, rtol=1e-4, atol=1e-4), "mismatch vs reference"

    print("KERNEL_OK")
</pallas_src>

<mosaic_0001>
module attributes {stable_mosaic.version = 11 : i64} {
  func.func @_dws_kernel(%arg0: i32, %arg1: i32, %arg2: memref<1x4x128xf32, #tpu.memory_space<vmem>>, %arg3: memref<1x1x4x16xf32, #tpu.memory_space<vmem>>, %arg4: memref<1x1x4x16xf32, #tpu.memory_space<vmem>>, %arg5: memref<4x9xf32, #tpu.memory_space<vmem>>, %arg6: memref<8x4xf32, #tpu.memory_space<vmem>>, %arg7: memref<8x1xf32, #tpu.memory_space<vmem>>, %arg8: memref<1x8x128xf32, #tpu.memory_space<vmem>>, %arg9: memref<4x162xf32, #tpu.memory_space<vmem>>) attributes {dimension_semantics = [#tpu.dimension_semantics<parallel>, #tpu.dimension_semantics<parallel>], iteration_bounds = array<i64: 2, 2>, scalar_prefetch = 0 : i64, scratch_operands = 1 : i64, tpu.core_type = #tpu.core_type<tc>, window_params = [{transform_indices = @transform_0, window_bounds = array<i64: 1, 4, 128>}, {transform_indices = @transform_1, window_bounds = array<i64: 1, 1, 4, 16>}, {transform_indices = @transform_2, window_bounds = array<i64: 1, 1, 4, 16>}, {pipeline_mode = #tpu.pipeline_mode<synchronous>, transform_indices = @transform_3, window_bounds = array<i64: 4, 9>}, {pipeline_mode = #tpu.pipeline_mode<synchronous>, transform_indices = @transform_4, window_bounds = array<i64: 8, 4>}, {pipeline_mode = #tpu.pipeline_mode<synchronous>, transform_indices = @transform_5, window_bounds = array<i64: 8, 1>}, {transform_indices = @transform_6, window_bounds = array<i64: 1, 8, 128>}]} {
    %c0 = arith.constant 0 : index
    %c0_0 = arith.constant 0 : index
    %c0_1 = arith.constant 0 : index
    %c0_2 = arith.constant 0 : index
    %0 = vector.load %arg3[%c0, %c0_0, %c0_1, %c0_2] : memref<1x1x4x16xf32, #tpu.memory_space<vmem>>, vector<1x1x4x16xf32>
    %1 = vector.shape_cast %0 : vector<1x1x4x16xf32> to vector<4x16xf32>
    %c0_3 = arith.constant 0 : index
    %c1 = arith.constant 1 : index
    %2 = vector.load %arg9[%c0_3, %c1] : memref<4x162xf32, #tpu.memory_space<vmem>>, vector<4x16xf32>
    tpu.vector_store %arg9[%c0_3, %c1], %1 {strides = array<i32>} : memref<4x162xf32, #tpu.memory_space<vmem>>, vector<4x16xf32>,
    %c0_4 = arith.constant 0 : index
    %c0_5 = arith.constant 0 : index
    %c0_6 = arith.constant 0 : index
    %3 = vector.load %arg2[%c0_4, %c0_5, %c0_6] : memref<1x4x128xf32, #tpu.memory_space<vmem>>, vector<1x4x128xf32>
    %4 = vector.shape_cast %3 : vector<1x4x128xf32> to vector<4x128xf32>
    %c0_7 = arith.constant 0 : index
    %c17 = arith.constant 17 : index
    %5 = vector.load %arg9[%c0_7, %c17] : memref<4x162xf32, #tpu.memory_space<vmem>>, vector<4x128xf32>
    tpu.vector_store %arg9[%c0_7, %c17], %4 {strides = array<i32>} : memref<4x162xf32, #tpu.memory_space<vmem>>, vector<4x128xf32>,
    %c0_8 = arith.constant 0 : index
    %c0_9 = arith.constant 0 : index
    %c0_10 = arith.constant 0 : index
    %c0_11 = arith.constant 0 : index
    %6 = vector.load %arg4[%c0_8, %c0_9, %c0_10, %c0_11] : memref<1x1x4x16xf32, #tpu.memory_space<vmem>>, vector<1x1x4x16xf32>
    %7 = vector.shape_cast %6 : vector<1x1x4x16xf32> to vector<4x16xf32>
    %c0_12 = arith.constant 0 : index
    %c145 = arith.constant 145 : index
    %8 = vector.load %arg9[%c0_12, %c145] : memref<4x162xf32, #tpu.memory_space<vmem>>, vector<4x16xf32>
    tpu.vector_store %arg9[%c0_12, %c145], %7 {strides = array<i32>} : memref<4x162xf32, #tpu.memory_space<vmem>>, vector<4x16xf32>,
    %9 = tpu.iota {dimensions = array<i32: 1>} : vector<4x128xi32>
    %c16_i32 = arith.constant 16 : i32
    %c0_i32 = arith.constant 0 : i32
    %10 = arith.cmpi eq, %c16_i32, %c0_i32 : i32
    %c1_i32 = arith.constant 1 : i32
    %11 = arith.select %10, %c1_i32, %c16_i32 : i32
    %12 = vector.broadcast %11 : i32 to vector<4x128xi32>
    %13 = arith.remsi %9, %12 : vector<4x128xi32>
    %c0_i32_13 = arith.constant 0 : i32
    %14 = vector.broadcast %c0_i32_13 : i32 to vector<4x128xi32>
    %15 = arith.cmpi ne, %13, %14 : vector<4x128xi32>
    %c0_i32_14 = arith.constant 0 : i32
    %16 = vector.broadcast %c0_i32_14 : i32 to vector<4x128xi32>
    %17 = arith.cmpi slt, %13, %16 : vector<4x128xi32>
    %c0_i32_15 = arith.constant 0 : i32
    %18 = arith.cmpi slt, %11, %c0_i32_15 : i32
    %19 = vector.broadcast %18 : i1 to vector<4x128xi1>
    %20 = vector.broadcast %19 : vector<4x128xi1> to vector<4x128xi1>
    %21 = arith.xori %17, %20 : vector<4x128xi1>
    %22 = arith.andi %21, %15 : vector<4x128xi1>
    %23 = vector.broadcast %11 : i32 to vector<4x128xi32>
    %24 = arith.addi %13, %23 : vector<4x128xi32>
    %25 = arith.select %22, %24, %13 : vector<4x128xi1>, vector<4x128xi32>
    %c1_i32_16 = arith.constant 1 : i32
    %26 = vector.broadcast %c1_i32_16 : i32 to vector<4x128xi32>
    %27 = arith.cmpi sge, %25, %26 : vector<4x128xi32>
    %c14_i32 = arith.constant 14 : i32
    %28 = vector.broadcast %c14_i32 : i32 to vector<4x128xi32>
    %29 = arith.cmpi sle, %25, %28 : vector<4x128xi32>
    %cst = arith.constant 0.000000e+00 : f32
    %30 = vector.broadcast %cst : f32 to vector<4x128xf32>
    %c0_17 = arith.constant 0 : index
    %c0_18 = arith.constant 0 : index
    %31 = vector.load %arg5[%c0_17, %c0_18] : memref<4x9xf32, #tpu.memory_space<vmem>>, vector<4x1xf32>
    %c0_19 = arith.constant 0 : index
    %c0_20 = arith.constant 0 : index
    %32 = vector.load %arg9[%c0_19, %c0_20] : memref<4x162xf32, #tpu.memory_space<vmem>>, vector<4x128xf32>
    %33 = vector.broadcast %31 : vector<4x1xf32> to vector<4x128xf32>
    %34 = arith.mulf %32, %33 : vector<4x128xf32>
    %cst_21 = arith.constant 0.000000e+00 : f32
    %35 = vector.broadcast %cst_21 : f32 to vector<4x128xf32>
    %36 = arith.select %27, %34, %35 : vector<4x128xi1>, vector<4x128xf32>
    %37 = arith.addf %30, %36 : vector<4x128xf32>
    %c0_22 = arith.constant 0 : index
    %c1_23 = arith.constant 1 : index
    %38 = vector.load %arg5[%c0_22, %c1_23] : memref<4x9xf32, #tpu.memory_space<vmem>>, vector<4x1xf32>
    %c0_24 = arith.constant 0 : index
    %c1_25 = arith.constant 1 : index
    %39 = vector.load %arg9[%c0_24, %c1_25] : memref<4x162xf32, #tpu.memory_space<vmem>>, vector<4x128xf32>
    %40 = vector.broadcast %38 : vector<4x1xf32> to vector<4x128xf32>
    %41 = arith.mulf %39, %40 : vector<4x128xf32>
    %42 = arith.addf %37, %41 : vector<4x128xf32>
    %c0_26 = arith.constant 0 : index
    %c2 = arith.constant 2 : index
    %43 = vector.load %arg5[%c0_26, %c2] : memref<4x9xf32, #tpu.memory_space<vmem>>, vector<4x1xf32>
    %c0_27 = arith.constant 0 : index
    %c2_28 = arith.constant 2 : index
    %44 = vector.load %arg9[%c0_27, %c2_28] : memref<4x162xf32, #tpu.memory_space<vmem>>, vector<4x128xf32>
    %45 = vector.broadcast %43 : vector<4x1xf32> to vector<4x128xf32>
    %46 = arith.mulf %44, %45 : vector<4x128xf32>
    %cst_29 = arith.constant 0.000000e+00 : f32
    %47 = vector.broadcast %cst_29 : f32 to vector<4x128xf32>
    %48 = arith.select %29, %46, %47 : vector<4x128xi1>, vector<4x128xf32>
    %49 = arith.addf %42, %48 : vector<4x128xf32>
    %c0_30 = arith.constant 0 : index
    %c3 = arith.constant 3 : index
    %50 = vector.load %arg5[%c0_30, %c3] : memref<4x9xf32, #tpu.memory_space<vmem>>, vector<4x1xf32>
    %c0_31 = arith.constant 0 : index
    %c16 = arith.constant 16 : index
    %51 = vector.load %arg9[%c0_31, %c16] : memref<4x162xf32, #tpu.memory_space<vmem>>, vector<4x128xf32>
    %52 = vector.broadcast %50 : vector<4x1xf32> to vector<4x128xf32>
    %53 = arith.mulf %51, %52 : vector<4x128xf32>
    %cst_32 = arith.constant 0.000000e+00 : f32
    %54 = vector.broadcast %cst_32 : f32 to vector<4x128xf32>
    %55 = arith.select %27, %53, %54 : vector<4x128xi1>, vector<4x128xf32>
    %56 = arith.addf %49, %55 : vector<4x128xf32>
    %c0_33 = arith.constant 0 : index
    %c4 = arith.constant 4 : index
    %57 = vector.load %arg5[%c0_33, %c4] : memref<4x9xf32, #tpu.memory_space<vmem>>, vector<4x1xf32>
    %c0_34 = arith.constant 0 : index
    %c17_35 = arith.constant 17 : index
    %58 = vector.load %arg9[%c0_34, %c17_35] : memref<4x162xf32, #tpu.memory_space<vmem>>, vector<4x128xf32>
    %59 = vector.broadcast %57 : vector<4x1xf32> to vector<4x128xf32>
    %60 = arith.mulf %58, %59 : vector<4x128xf32>
    %61 = arith.addf %56, %60 : vector<4x128xf32>
    %c0_36 = arith.constant 0 : index
    %c5 = arith.constant 5 : index
    %62 = vector.load %arg5[%c0_36, %c5] : memref<4x9xf32, #tpu.memory_space<vmem>>, vector<4x1xf32>
    %c0_37 = arith.constant 0 : index
    %c18 = arith.constant 18 : index
    %63 = vector.load %arg9[%c0_37, %c18] : memref<4x162xf32, #tpu.memory_space<vmem>>, vector<4x128xf32>
    %64 = vector.broadcast %62 : vector<4x1xf32> to vector<4x128xf32>
    %65 = arith.mulf %63, %64 : vector<4x128xf32>
    %cst_38 = arith.constant 0.000000e+00 : f32
    %66 = vector.broadcast %cst_38 : f32 to vector<4x128xf32>
    %67 = arith.select %29, %65, %66 : vector<4x128xi1>, vector<4x128xf32>
    %68 = arith.addf %61, %67 : vector<4x128xf32>
    %c0_39 = arith.constant 0 : index
    %c6 = arith.constant 6 : index
    %69 = vector.load %arg5[%c0_39, %c6] : memref<4x9xf32, #tpu.memory_space<vmem>>, vector<4x1xf32>
    %c0_40 = arith.constant 0 : index
    %c32 = arith.constant 32 : index
    %70 = vector.load %arg9[%c0_40, %c32] : memref<4x162xf32, #tpu.memory_space<vmem>>, vector<4x128xf32>
    %71 = vector.broadcast %69 : vector<4x1xf32> to vector<4x128xf32>
    %72 = arith.mulf %70, %71 : vector<4x128xf32>
    %cst_41 = arith.constant 0.000000e+00 : f32
    %73 = vector.broadcast %cst_41 : f32 to vector<4x128xf32>
    %74 = arith.select %27, %72, %73 : vector<4x128xi1>, vector<4x128xf32>
    %75 = arith.addf %68, %74 : vector<4x128xf32>
    %c0_42 = arith.constant 0 : index
    %c7 = arith.constant 7 : index
    %76 = vector.load %arg5[%c0_42, %c7] : memref<4x9xf32, #tpu.memory_space<vmem>>, vector<4x1xf32>
    %c0_43 = arith.constant 0 : index
    %c33 = arith.constant 33 : index
    %77 = vector.load %arg9[%c0_43, %c33] : memref<4x162xf32, #tpu.memory_space<vmem>>, vector<4x128xf32>
    %78 = vector.broadcast %76 : vector<4x1xf32> to vector<4x128xf32>
    %79 = arith.mulf %77, %78 : vector<4x128xf32>
    %80 = arith.addf %75, %79 : vector<4x128xf32>
    %c0_44 = arith.constant 0 : index
    %c8 = arith.constant 8 : index
    %81 = vector.load %arg5[%c0_44, %c8] : memref<4x9xf32, #tpu.memory_space<vmem>>, vector<4x1xf32>
    %c0_45 = arith.constant 0 : index
    %c34 = arith.constant 34 : index
    %82 = vector.load %arg9[%c0_45, %c34] : memref<4x162xf32, #tpu.memory_space<vmem>>, vector<4x128xf32>
    %83 = vector.broadcast %81 : vector<4x1xf32> to vector<4x128xf32>
    %84 = arith.mulf %82, %83 : vector<4x128xf32>
    %cst_46 = arith.constant 0.000000e+00 : f32
    %85 = vector.broadcast %cst_46 : f32 to vector<4x128xf32>
    %86 = arith.select %29, %84, %85 : vector<4x128xi1>, vector<4x128xf32>
    %87 = arith.addf %80, %86 : vector<4x128xf32>
    %c0_47 = arith.constant 0 : index
    %c0_48 = arith.constant 0 : index
    %88 = vector.load %arg6[%c0_47, %c0_48] : memref<8x4xf32, #tpu.memory_space<vmem>>, vector<8x4xf32>
    %cst_49 = arith.constant dense<0.000000e+00> : vector<8x128xf32>
    %89 = tpu.matmul %88, %87, %cst_49 {dimension_numbers = #tpu.dot_dimension_numbers<[1], [0], [0], [1], [0, 0, 1, 1], [], []>} : vector<8x4xf32>, vector<4x128xf32>, vector<8x128xf32> -> vector<8x128xf32>
    %c0_50 = arith.constant 0 : index
    %c0_51 = arith.constant 0 : index
    %90 = vector.load %arg7[%c0_50, %c0_51] : memref<8x1xf32, #tpu.memory_space<vmem>>, vector<8x1xf32>
    %91 = vector.broadcast %90 : vector<8x1xf32> to vector<8x128xf32>
    %92 = arith.addf %89, %91 : vector<8x128xf32>
    %c0_52 = arith.constant 0 : index
    %c0_53 = arith.constant 0 : index
    %c0_54 = arith.constant 0 : index
    %93 = vector.load %arg8[%c0_52, %c0_53, %c0_54] : memref<1x8x128xf32, #tpu.memory_space<vmem>>, vector<1x8x128xf32>
    %94 = vector.shape_cast %93 : vector<1x8x128xf32> to vector<8x128xf32>
    %95 = vector.shape_cast %92 : vector<8x128xf32> to vector<1x8x128xf32>
    tpu.vector_store %arg8[%c0_52, %c0_53, %c0_54], %95 {strides = array<i32>} : memref<1x8x128xf32, #tpu.memory_space<vmem>>, vector<1x8x128xf32>,
    return
  }
  func.func @transform_0(%arg0: i32, %arg1: i32) -> (i32, i32, i32) {
    %c0_i32 = arith.constant 0 : i32
    %c0_i32_0 = arith.constant 0 : i32
    return %arg0, %c0_i32, %arg1 : i32, i32, i32
  }
  func.func @transform_1(%arg0: i32, %arg1: i32) -> (i32, i32, i32, i32) {
    %c0_i32 = arith.constant 0 : i32
    %c0_i32_0 = arith.constant 0 : i32
    %c0_i32_1 = arith.constant 0 : i32
    return %arg0, %arg1, %c0_i32, %c0_i32_0 : i32, i32, i32, i32
  }
  func.func @transform_2(%arg0: i32, %arg1: i32) -> (i32, i32, i32, i32) {
    %c0_i32 = arith.constant 0 : i32
    %c0_i32_0 = arith.constant 0 : i32
    %c0_i32_1 = arith.constant 0 : i32
    return %arg0, %arg1, %c0_i32, %c0_i32_0 : i32, i32, i32, i32
  }
  func.func @transform_3(%arg0: i32, %arg1: i32) -> (i32, i32) {
    %c0_i32 = arith.constant 0 : i32
    %c0_i32_0 = arith.constant 0 : i32
    %c0_i32_1 = arith.constant 0 : i32
    return %c0_i32, %c0_i32_0 : i32, i32
  }
  func.func @transform_4(%arg0: i32, %arg1: i32) -> (i32, i32) {
    %c0_i32 = arith.constant 0 : i32
    %c0_i32_0 = arith.constant 0 : i32
    %c0_i32_1 = arith.constant 0 : i32
    return %c0_i32, %c0_i32_0 : i32, i32
  }
  func.func @transform_5(%arg0: i32, %arg1: i32) -> (i32, i32) {
    %c0_i32 = arith.constant 0 : i32
    %c0_i32_0 = arith.constant 0 : i32
    %c0_i32_1 = arith.constant 0 : i32
    return %c0_i32, %c0_i32_0 : i32, i32
  }
  func.func @transform_6(%arg0: i32, %arg1: i32) -> (i32, i32, i32) {
    %c0_i32 = arith.constant 0 : i32
    %c0_i32_0 = arith.constant 0 : i32
    return %arg0, %c0_i32, %arg1 : i32, i32, i32
  }
}

</mosaic_0001>

<bundles_post_ra>
// kernel: tpu_custom_call.1
= control target key start
LH: loop header
LB: loop body
LE: loop exit
PB: predicated region body
PF: predicated region fallthrough
CT: control target
= control target key end

     0   :  { %s1326_s0 = inlined_call_operand.vmem [shape: f32[2,4,256], index: 0, kind: input, shape index: {}]   ;;  %s1327_s1 = inlined_call_operand.hbm [shape: f32[2,2,4,16], index: 1, kind: input, shape index: {}]   ;;  %s1328_s2 = inlined_call_operand.hbm [shape: f32[2,2,4,16], index: 2, kind: input, shape index: {}]   ;;  %s1329_s3 = inlined_call_operand.vmem [shape: f32[4,9], index: 3, kind: input, shape index: {}]   ;;  %s1330_s4 = inlined_call_operand.vmem [shape: f32[8,4], index: 4, kind: input, shape index: {}]   ;;  %s1331_s5 = inlined_call_operand.vmem [shape: f32[8,1], index: 5, kind: input, shape index: {}]   ;;  %s1332_s6 = inlined_call_operand.hbm [shape: f32[2,8,256], index: 6, kind: output, shape index: {}]  }
   0x1   :  { %1337 = sst [smem:[#allocation16_spill]] %s1327_s1 }
   0x2   :  { %11 = vsyncpa [#allocation4], 0 }
   0x3   :  { %13 = vsyncpa [#allocation4 + $0x1], 0 }
   0x4   :  { %14 = vsyncpa [#allocation7], 0 }
   0x5   :  { %16 = vsyncpa [#allocation7 + $0x1], 0 }
   0x6   :  { %17 = vsyncpa [#allocation5], 0 }
   0x7   :  { %19 = vsyncpa [#allocation5 + $0x1], 0  ;;  %s1110_s21 = smov 0   ;;  %s1112_s22 = smov 0  }
   0x8   :  { %s1114_s23 = smov 0   ;;  %s1116_s24 = smov 0  }
   0x9   :  { %s1118_s25 = smov 0   ;;  %s1120_s26 = smov 0  }
   0xa   :  { %s1122_s27 = smov 0   ;;  %s1124_s28 = smov 0  }
   0xb LB: > { %1338 = sst [smem:[#allocation12_spill]] %s1026_s21  ;;  %s758_s29 = sadd.s32 4294967295, %s1054_s28   ;;  %s1054_s28 = sphi %s1124_s28, %s25_s28   ;;  %s1050_s27 = sphi %s1122_s27, %s1355_s27   ;;  %s1046_s26 = sphi %s1120_s26, %s1360_s26   ;;  %s1042_s25 = sphi %s1118_s25, %s1353_s25   ;;  %s1038_s24 = sphi %s1116_s24, %s1359_s24   ;;  %s1034_s23 = sphi %s1114_s23, %s1358_s23   ;;  %s1030_s22 = sphi %s1112_s22, %s1357_s22   ;;  %s1026_s21 = sphi %s1110_s21, %s1356_s21  }
   0xc   : > { %1339 = sst [smem:[#allocation13_spill]] %s1050_s27  ;;  %s759_s30 = sadd.s32 4294967294, %s1054_s28  }
   0xd   : > { %s34_s7 = sadd.s32 1, %s1046_s26  ;;  %s37_s8 = sadd.s32 1, %s1050_s27 }
   0xe   : > { %p35_p0 = scmp.ge.s32.totalorder %s34_s7, 2  ;;  %s74_s9 = sadd.s32 1, %s1034_s23 }
   0xf   : > { %p81_p1 = scmp.ne.s32.totalorder %s1034_s23, %s1030_s22  ;;  %p82_p2 = scmp.eq.s32.totalorder %s1054_s28, 0 }
  0x10   : > { %s1362_s7 = smov (%p35_p0, %s34_s7), 0  ;;  %s1364_s8 = smov (!%p35_p0, %s37_s8), %s1050_s27 }
  0x11   : > { %1340 = sst [smem:[#allocation14_spill]] %s1362_s7  ;;  %s70_s10 = ssub.s32 %s1046_s26, %s1362_s7 }
  0x12   : > { %p1163_p3 = por %p82_p2, %p81_p1  ;;  %p39_p4 = scmp.ge.s32.totalorder %s1364_s8, 2 }
  0x13   : > { %p87_p5 = scmp.ne.s32.totalorder %s1030_s22, %s1026_s21  ;;  %p88_p6 = scmp.eq.s32.totalorder %s758_s29, 0 }
  0x14   : > { %p204_p7 = scmp.eq.s32.totalorder %s758_s29, 3  ;;  %s1366_s8 = smov (%p39_p4, %s1364_s8), 0 }
  0x15   : > { %1342 = sst [smem:[#allocation15_spill]] %s1366_s8  ;;  %p1171_p8 = por %p88_p6, %p87_p5 }
  0x16   : > { %p1175_p9 = por %p204_p7, %p81_p1  ;;  %s69_s14 = ssub.s32 %s1050_s27, %s1366_s8 }
  0x17   : > { %p210_p10 = scmp.eq.s32.totalorder %s759_s30, 3  ;;  %s71_s15 = sor.u32 %s70_s10, %s69_s14 }
  0x18   : > { %p72_p11 = scmp.eq.s32.totalorder %s71_s15, 0  ;;  %p798_p13 = scmp.lt.s32.totalorder %s1054_s28, 4 }
  0x19   : > { %p1181_p12 = por %p210_p10, %p87_p5  ;;  %s250_s17 = sand.u32 1, %s1034_s23  }
  0x1a   : > { %s1188_s18 = scalar_select %p72_p11, %s1034_s23, %s74_s9  }
  0x1b   : > { %s762_s19 = sshll.u32 %s250_s17, 2  ;;  %s763_s20 = sshll.u32 %s1050_s27, 1 }
  0x1c   : > { %s258_s29 = sadd.s32 %s1046_s26, %s763_s20  ;;  %s254_s7 = scalar_lea.vmem [#allocation3], %s762_s19 }
  0x1d   : > { %s264_s21 = sshll.u32 %s254_s7, 4  ;;  %s764_s8 = sshll.u32 %s258_s29, 2  ;;  %s265_s21 = int_to_ptr.vmem [resolvable:$true] %s264_s21 }
  0x1e   : > { %s1346_s1 = sld [smem:[#allocation16_spill]]  ;;  %p1197_p0 = pnand %p798_p13, %p1163_p3 }
  0x1f   : > { %p768_p1 = scmp.ge.s32.totalorder %s1054_s28, 1  ;;  %s251_s27 = scalar_lea.sflag [#allocation4], %s250_s17 }
  0x20   : > { %p290_p2 = scmp.lt.s32.totalorder %s1054_s28, 5  ;;  %s281_s29 = scalar_lea.hbm %s1328_s2, %s764_s8 }
  0x21   : > { %s283_s30 = sshll.u32 %s281_s29, 4  ;;  %s275_s11 = scalar_lea.vmem [#allocation6], %s762_s19  ;;  %s284_s30 = int_to_ptr.hbm [resolvable:$true] %s283_s30 }
  0x22   : > { %p291_p4 = pnand %p768_p1, %p290_p2  ;;  %s285_s10 = sshll.u32 %s275_s11, 4  ;;  %s286_s10 = int_to_ptr.vmem [resolvable:$true] %s285_s10 }
  0x24   : > { %s260_s14 = scalar_lea.hbm %s1346_s1, %s764_s8  ;;  %s272_s1 = scalar_lea.sflag [#allocation7], %s250_s17 }
  0x25   : > { %s262_s9 = sshll.u32 %s260_s14, 4  ;;  %294 = sbr.rel (%p291_p4) target bundleno = 506 (0x1fa), region = 44  ;;  %s263_s9 = int_to_ptr.hbm [resolvable:$true] %s262_s9 }
  0x26   : > { %790 = dma.hbm_to_vmem [thread:$0]  (!%p1197_p0), %s263_s9, 64, %s265_s21, %s251_s27  }
  0x27   : > { %793 = dma.hbm_to_vmem [thread:$0]  (!%p1197_p0), %s284_s30, 64, %s286_s10, %s272_s1  }
  0x28   : > { %s1211_s14 = sand.u32 (!%p291_p4), 1, %s1030_s22  }
  0x29   : > { %s769_s21 = sshll.u32 (!%p291_p4), %s1211_s14, 2  ;;  %s297_s27 = scalar_lea.sflag (!%p291_p4), [#allocation4], %s1211_s14 }
  0x2a   : > { %s300_s9 = scalar_lea.vmem [#allocation3], %s769_s21 }
  0x2b   : > { %1013 = dma.done.wait (%p1171_p8), %s297_s27, 64  }
  0x2c   : > { %1015 = vsyncadd (%p1171_p8), %s297_s27, 4294967232  ;;  %s307_s8 = scalar_lea.sflag [#allocation7], %s1211_s14  ;;  %s310_s17 = scalar_lea.vmem [#allocation6], %s769_s21 }
  0x2d   : > { %1017 = dma.done.wait (%p1171_p8), %s307_s8, 64  }
  0x2e   : > { %1019 = vsyncadd (%p1171_p8), %s307_s8, 4294967232  ;;  %p353_p3 = scmp.lt.s32.totalorder %s1042_s25, 1  ;;  %p355_p5 = scmp.lt.s32.totalorder %s1038_s24, 1  ;;  %v1056_v0 = vmov 1   ;;  %v1057_v1 = vmov 2   ;;  %v1058_v2 = vmov 4  }
  0x2f   : > { %883 = vset.pattern.permute.xlu1 %v1056_v0  ;;  %884 = vset.pattern.permute.xlu2 %v1057_v1  ;;  %v380_v3 = vld [vmem:[%s310_s17] sm:$0xf]  ;;  %s1059_s11 = smov 17   ;;  %v431_v5 = vld [vmem:[%s1329_s3] sm:$0xf]  ;;  %v1061_v9 = vmov 3  }
  0x30   : > { %s354_s1 = scalar_select %p353_p3, %s1042_s25, 1  ;;  %886 = vset.pattern.permute.xlu0 %v1058_v2  ;;  %382 = vrot.lane.b32.xlu1 %v380_v3, %s1059_s11  ;;  %v403_v6 = vld [vmem:[%s1329_s3] sm:$0xf]  ;;  %v361_v7 = vld [vmem:[%s300_s9] sm:$0xf]  ;;  %v1062_v12 = vmov 5   ;;  %v387_v3 = vlaneseq }
  0x31   : > { %s356_s19 = scalar_select %p355_p5, %s1038_s24, 1  ;;  %435 = vperm.xlu2 %884, %v431_v5   ;;  %v452_v8 = vld [vmem:[%s1329_s3] sm:$0xf]  ;;  %v1063_v14 = vmov 6   ;;  %v1064_v16 = vmov 7   ;;  %v1065_v17 = vmov 0  }
  0x32   : > { %s772_s15 = sshll.u32 %s354_s1, 1  ;;  %v493_v10 = vld [vmem:[%s1329_s3] sm:$0xf]  ;;  %v1066_v19 = vmov 8   ;;  %vm376_vm0 = vcmask 1043592   ;;  %vm377_vm1 = vcmask 138244  }
  0x33   : > { %s358_s7 = sadd.s32 %s772_s15, %s356_s19  ;;  %s1060_s19 = smov 1   ;;  %v473_v11 = vld [vmem:[%s1329_s3] sm:$0xf]  ;;  %vm373_vm2 = vcmask 138240   ;;  %vm366_vm3 = vcmask 134152   ;;  %vm378_vm4 = vmor %vm377_vm1, %vm376_vm0  ;;  %vm385_vm5 = vcmask 265352  }
  0x34   : > { %s773_s20 = sshll.u32 %s358_s7, 2  ;;  %v514_v13 = vld [vmem:[%s1329_s3] sm:$0xf]  ;;  %s1067_s27 = smov 127   ;;  %vm447_vm6 = vcmask 1031168   ;;  %vm427_vm7 = vcmask 1039360  }
  0x35   : > { %s360_s30 = scalar_lea.vmem %s1326_s0, %s773_s20  ;;  %v535_v15 = vld [vmem:[%s1329_s3] sm:$0xf]  ;;  %s1068_s8 = smov 126   ;;  %vm468_vm8 = vcmask 916480   ;;  %vm509_vm11 = vcmask 900096   ;;  %vm489_vm12 = vcmask 908288  }
  0x36   : > { %v368_v4 = vld [vmem:[%s360_s30] sm:$0xf]  ;;  %s1069_s1 = smov 112   ;;  %s1070_s17 = smov 111   ;;  %vm530_vm13 = vcmask 785408   ;;  %vm551_vm14 = vcmask 777216  }
  0x37   : > { %370 = vrot.lane.b32.xlu0 %v368_v4, %s1059_s11  ;;  %v555_v18 = vld [vmem:[%s1329_s3] sm:$0xf]  ;;  %s1072_s15 = smov 96   ;;  %s1073_s7 = smov 95   ;;  %v388_v4 = vand.u32 127, %v387_v3  ;;  %vm571_vm15 = vcmask 769024  }
  0x38   : > { %415 = vperm.xlu1 %883, %v403_v6   ;;  %v577_v56 = vld [vmem:[%s1331_s5] sm:$0xff]  ;;  %s1074_s9 = smov 94   ;;  %vm587_vm0 = vcmask 1043456   ;;  %vm583_vm1 = vcmask 31744   ;;  %s777_s11 = sshll.u32 %s1042_s25, 1 }
  0x39   : > { %885 = vset.pattern.permute.xlu2 %v1061_v9  ;;  %s623_s10 = sadd.s32 %s1038_s24, %s777_s11  ;;  %s771_s21 = sshll.u32 %s1211_s14, 3 }
  0x3a   : > { %456 = vperm.xlu2 %885, %v452_v8   ;;  %s613_s20 = scalar_lea.sflag [#allocation5], %s1211_s14  ;;  %s972_s29 = scalar_lea.hbm %s1332_s6, 32 }
  0x3f   : > { %363 = vrot.lane.b32.xlu0 %v361_v7, %s1060_s19  ;;  %s1071_s19 = smov 110   ;;  %v393_v7 = vand.u32 15, %v388_v4 }
  0x40   : > { %887 = vset.pattern.permute.xlu1 %v1062_v12 }
  0x41   : > { %497 = vperm.xlu1 %887, %v493_v10   ;;  %vm1258_vm9 = vcmp.ge.s32.totalorder %v393_v7, 1  ;;  %vm1262_vm10 = vcmp.le.s32.totalorder %v393_v7, 14 }
  0x42   : > { %888 = vset.pattern.permute.xlu2 %v1063_v14 }
  0x43   : > { %518 = vperm.xlu2 %888, %v514_v13  }
  0x47   : > { %477 = vperm.xlu0 %886, %v473_v11  }
  0x49   : > { %889 = vset.pattern.permute.xlu1 %v1064_v16 }
  0x4a   : > { %539 = vperm.xlu1 %889, %v535_v15  }
  0x4b   : > { %890 = vset.pattern.permute.xlu2 %v1066_v19 }
  0x4c   : > { %559 = vperm.xlu2 %890, %v555_v18  }
  0x4f   : > { %891 = vset.pattern.permute.xlu0 %v1065_v17 }
  0x50   : > { %407 = vperm.xlu0 %891, %v403_v6  }
  0x8b   : > { %v436_v28 = vpop.permute.xlu2 %435 }
  0x94   : > { %v457_v32 = vpop.permute.xlu2 %456 }
  0x9d   : > { %v519_v44 = vpop.permute.xlu2 %518 }
  0xa2   : > { %v383_v22 = vpop.permute.xlu1 %382 }
  0xa6   : > { %v560_v52 = vpop.permute.xlu2 %559 }
  0xa9   : > { %v371_v20 = vpop.permute.xlu0 %370 }
  0xaa   : > { %v372_v21 = vrot.slane %v371_v20, 4  ;;  %v416_v26 = vpop.permute.xlu1 %415 }
  0xac   : > { %v374_v24 = vsel %vm373_vm2, %v372_v21, %v371_v20 }
  0xb1   : > { %v364_v23 = vpop.permute.xlu0 %363 }
  0xb2   : > { %367 = vst.msk [vmem:[#allocation2] sm:$0xf] %vm366_vm3, %v364_v23 }
  0xb3   : > { %379 = vst.msk [vmem:[#allocation2] sm:$0xff] %vm378_vm4, %v374_v24  ;;  %v498_v40 = vpop.permute.xlu1 %497 }
  0xb4   : > { %386 = vst.msk [vmem:[#allocation2 + $0x4] sm:$0xf] %vm385_vm5, %v383_v22 }
  0xb9   : > { %v478_v36 = vpop.permute.xlu0 %477 }
  0xba   : > { %v404_v9 = vld [vmem:[#allocation2] sm:$0xf] }
  0xbb   : > { %v453_v25 = vld [vmem:[#allocation2] sm:$0xff] }
  0xbc   : > { %v418_v27 = vmul.f32 %v453_v25, %v416_v26  ;;  %v438_v29 = vmul.f32 %v453_v25, %v436_v28  ;;  %v459_v33 = vmul.f32 %v457_v32, %v453_v25  ;;  %v480_v37 = vmul.f32 %v478_v36, %v453_v25  ;;  %v540_v48 = vpop.permute.xlu1 %539 }
  0xbd   : > { %v500_v41 = vmul.f32 %v498_v40, %v453_v25  ;;  %v521_v45 = vmul.f32 %v519_v44, %v453_v25  ;;  %v542_v49 = vmul.f32 %v540_v48, %v453_v25  ;;  %v562_v53 = vmul.f32 %v560_v52, %v453_v25 }
  0xbe   : > { %420 = vst [vmem:[#allocation1] ss:$2 sm:$0xff] %v418_v27 }
  0xc2   : > { %v408_v61 = vpop.permute.xlu0 %407 }
  0xc3   : > { %v410_v10 = vmul.f32 %v408_v61, %v404_v9 }
  0xc5   : > { %v421_v30 = vld.sshfl [vmem:[#allocation1] sm:$0xff pattern:$0x75316420]  ;;  %v422_v31 = vld.sshfl [vmem:[#allocation1 + $0x8] sm:$0xff pattern:$0x75316420] }
  0xc6   : > { %440 = vst [vmem:[#allocation1] ss:$2 sm:$0xff] %v438_v29  ;;  %425 = vrot.lane.b32.xlu2 %v422_v31, %s1067_s27  ;;  %423 = vrot.lane.b32.xlu1 %v421_v30, %s1067_s27  ;;  %v411_v17 = vsel %vm1258_vm9, %v410_v10, 0.0  ;;  %s778_s27 = sshll.u32 %s623_s10, 3 }
  0xcd   : > { %v442_v34 = vld.sshfl [vmem:[#allocation1 + $0x8] sm:$0xff pattern:$0x75316420]  ;;  %v441_v35 = vld.sshfl [vmem:[#allocation1] sm:$0xff pattern:$0x75316420] }
  0xce   : > { %445 = vrot.lane.b32.xlu2 %v442_v34, %s1068_s8  ;;  %443 = vrot.lane.b32.xlu1 %v441_v35, %s1068_s8  ;;  %461 = vst [vmem:[#allocation1] ss:$2 sm:$0xff] %v459_v33 }
  0xd5   : > { %v463_v38 = vld.sshfl [vmem:[#allocation1 + $0x8] sm:$0xff pattern:$0x75316420]  ;;  %v462_v39 = vld.sshfl [vmem:[#allocation1] sm:$0xff pattern:$0x75316420] }
  0xd6   : > { %466 = vrot.lane.b32.xlu1 %v463_v38, %s1069_s1  ;;  %464 = vrot.lane.b32.xlu0 %v462_v39, %s1069_s1  ;;  %482 = vst [vmem:[#allocation1] ss:$2 sm:$0xff] %v480_v37 }
  0xdd   : > { %v484_v42 = vld.sshfl [vmem:[#allocation1 + $0x8] sm:$0xff pattern:$0x75316420]  ;;  %v483_v43 = vld.sshfl [vmem:[#allocation1] sm:$0xff pattern:$0x75316420] }
  0xde   : > { %487 = vrot.lane.b32.xlu0 %v484_v42, %s1070_s17  ;;  %485 = vrot.lane.b32.xlu2 %v483_v43, %s1070_s17  ;;  %502 = vst [vmem:[#allocation1] ss:$2 sm:$0xff] %v500_v41  ;;  %v576_v41 = vld [vmem:[%s1330_s4] sm:$0xff]  ;;  %s625_s17 = scalar_lea.hbm %s1332_s6, %s778_s27 }
  0xe5   : > { %v504_v46 = vld.sshfl [vmem:[#allocation1 + $0x8] sm:$0xff pattern:$0x75316420]  ;;  %v503_v47 = vld.sshfl [vmem:[#allocation1] sm:$0xff pattern:$0x75316420] }
  0xe6   : > { %507 = vrot.lane.b32.xlu2 %v504_v46, %s1071_s19  ;;  %505 = vrot.lane.b32.xlu1 %v503_v47, %s1071_s19  ;;  %523 = vst [vmem:[#allocation1] ss:$2 sm:$0xff] %v521_v45  ;;  %s352_s19 = scalar_lea.vmem [#allocation8], %s771_s21 }
  0xed   : > { %v525_v50 = vld.sshfl [vmem:[#allocation1 + $0x8] sm:$0xff pattern:$0x75316420]  ;;  %v524_v51 = vld.sshfl [vmem:[#allocation1] sm:$0xff pattern:$0x75316420] }
  0xee   : > { %528 = vrot.lane.b32.xlu1 %v525_v50, %s1072_s15  ;;  %526 = vrot.lane.b32.xlu0 %v524_v51, %s1072_s15  ;;  %544 = vst [vmem:[#allocation1] ss:$2 sm:$0xff] %v542_v49  ;;  %s627_s15 = sshll.u32 %s352_s19, 4  ;;  %s628_s15 = int_to_ptr.vmem [resolvable:$true] %s627_s15 }
  0xf5   : > { %v546_v54 = vld.sshfl [vmem:[#allocation1 + $0x8] sm:$0xff pattern:$0x75316420]  ;;  %v545_v55 = vld.sshfl [vmem:[#allocation1] sm:$0xff pattern:$0x75316420] }
  0xf6   : > { %549 = vrot.lane.b32.xlu0 %v546_v54, %s1073_s7  ;;  %547 = vrot.lane.b32.xlu2 %v545_v55, %s1073_s7  ;;  %564 = vst [vmem:[#allocation1] ss:$2 sm:$0xff] %v562_v53  ;;  %s629_s7 = sshll.u32 %s625_s17, 4  ;;  %s630_s7 = int_to_ptr.hbm [resolvable:$true] %s629_s7 }
  0xf7   : > { %s966_s12 = sshra.s32 %s630_s7, 4  ;;  %s967_s12 = int_to_ptr.hbm [resolvable:$true] %s966_s12 }
  0xf8   : > { %s968_s24 = scalar_lea.hbm %s967_s12, 8  ;;  %p973_p10 = scmp.lt.s32.totalorder %s967_s12, %s1332_s6 }
  0xf9   : > { %p969_p6 = scmp.ne.s32.totalorder %s967_s12, %s968_s24  ;;  %p974_p11 = scmp.lt.s32.totalorder %s972_s29, %s968_s24 }
  0xfb   : > { %p970_p7 = pnand %p969_p6, %p1175_p9  ;;  %p975_p13 = por %p974_p11, %p973_p10 }
  0xfd   : > { %v566_v57 = vld.sshfl [vmem:[#allocation1 + $0x8] sm:$0xff pattern:$0x75316420]  ;;  %v565_v58 = vld.sshfl [vmem:[#allocation1] sm:$0xff pattern:$0x75316420]  ;;  %p971_p8 = pneg %p970_p7 }
  0xfe   : > { %580 = vperm.xlu0 %891, %v577_v56   ;;  %569 = vrot.lane.b32.xlu2 %v566_v57, %s1074_s9 }
  0xff   : > { %567 = vrot.lane.b32.xlu1 %v565_v58, %s1074_s9  ;;  %p976_p0 = pnand %p975_p13, %p971_p8 }
 0x120   : > { %v426_v60 = vpop.permute.xlu2 %425 }
 0x128   : > { %v446_v63 = vpop.permute.xlu2 %445 }
 0x138   : > { %v424_v59 = vpop.permute.xlu1 %423  ;;  %v486_v1 = vpop.permute.xlu2 %485 }
 0x139   : > { %v428_v15 = vsel %vm427_vm7, %v424_v59, %v426_v60 }
 0x13a   : > { %v430_v19 = vadd.f32 %v428_v15, %v411_v17 }
 0x140   : > { %v444_v62 = vpop.permute.xlu1 %443  ;;  %v508_v8 = vpop.permute.xlu2 %507 }
 0x141   : > { %v448_v13 = vsel %vm447_vm6, %v444_v62, %v446_v63 }
 0x142   : > { %v450_v18 = vsel %vm1262_vm10, %v448_v13, 0.0 }
 0x143   : > { %v451_v23 = vadd.f32 %v450_v18, %v430_v19 }
 0x148   : > { %v465_v0 = vpop.permute.xlu0 %464  ;;  %v467_v2 = vpop.permute.xlu1 %466 }
 0x149   : > { %v469_v16 = vsel %vm468_vm8, %v465_v0, %v467_v2 }
 0x14a   : > { %v471_v20 = vsel %vm1258_vm9, %v469_v16, 0.0 }
 0x14b   : > { %v472_v26 = vadd.f32 %v471_v20, %v451_v23 }
 0x150   : > { %v488_v5 = vpop.permute.xlu0 %487  ;;  %v548_v21 = vpop.permute.xlu2 %547 }
 0x151   : > { %v490_v25 = vsel %vm489_vm12, %v486_v1, %v488_v5 }
 0x152   : > { %v492_v29 = vadd.f32 %v490_v25, %v472_v26 }
 0x158   : > { %v506_v6 = vpop.permute.xlu1 %505  ;;  %v570_v35 = vpop.permute.xlu2 %569 }
 0x159   : > { %v510_v24 = vsel %vm509_vm11, %v506_v6, %v508_v8 }
 0x15a   : > { %v512_v28 = vsel %vm1262_vm10, %v510_v24, 0.0 }
 0x15b   : > { %v513_v32 = vadd.f32 %v512_v28, %v492_v29 }
 0x160   : > { %v527_v14 = vpop.permute.xlu0 %526  ;;  %v529_v22 = vpop.permute.xlu1 %528 }
 0x161   : > { %v531_v27 = vsel %vm530_vm13, %v527_v14, %v529_v22 }
 0x162   : > { %v533_v31 = vsel %vm1258_vm9, %v531_v27, 0.0 }
 0x163   : > { %v534_v34 = vadd.f32 %v533_v31, %v513_v32 }
 0x168   : > { %v550_v30 = vpop.permute.xlu0 %549 }
 0x169   : > { %v552_v33 = vsel %vm551_vm14, %v548_v21, %v550_v30 }
 0x16a   : > { %v554_v37 = vadd.f32 %v552_v33, %v534_v34 }
 0x170   : > { %v581_v42 = vpop.permute.xlu0 %580 }
 0x171   : > { %v568_v36 = vpop.permute.xlu1 %567 }
 0x172   : > { %v572_v38 = vsel %vm571_vm15, %v568_v36, %v570_v35 }
 0x173   : > { %v574_v39 = vsel %vm1262_vm10, %v572_v38, 0.0 }
 0x174   : > { %v575_v40 = vadd.f32 %v574_v39, %v554_v37 }
 0x176   : > { %774 = vmatpush.msk.msra.mxu0 %vm587_vm0, %v575_v40 }
 0x177   : > { %775 = vmatmul.msk.f32.vlgmr.msra.gmra.mxu0 %vm583_vm1, %v576_v41 }
 0x1f4   : > { %v608_v43 = vpop.f32.mrf.mxu0 }
 0x1f5   : > { %v609_v44 = vadd.f32 %v608_v43, %v581_v42 }
 0x1f7   : > { %611 = vst [vmem:[%s352_s19] sm:$0xff] %v609_v44 }
 0x1f8   : > { %979 = shalt.err (!%p976_p0)
}
 0x1f9   : > { %785 = dma.vmem_to_hbm [thread:$0]  (%p1175_p9), %s628_s15, 128, %s630_s7, %s613_s20  }
 0x1fa PF: > { %s1352_s14 = sld [smem:[#allocation12_spill]]  ;;  %p799_p1 = scmp.ge.s32.totalorder %s1054_s28, 2 }
 0x1fc   : > { %p795_p2 = pnand %p799_p1, %p1181_p12 }
 0x1fe   : > { %p796_p4 = pneg %p795_p2 }
 0x200   : > { %s641_s10 = sand.u32 1, %s1352_s14  }
 0x201   : > { %s642_s21 = scalar_lea.sflag [#allocation5], %s641_s10 }
 0x202   : > { %1021 = dma.done.wait (%p796_p4), %s642_s21, 128  }
 0x203   : > { %1023 = vsyncadd (%p796_p4), %s642_s21, 4294967168  ;;  %s25_s28 = sadd.s32 1, %s1054_s28   ;;  %s1353_s25 = sld [smem:[#allocation13_spill]] }
 0x204   : > { %p22_p3 = scmp.ge.s32.totalorder %s25_s28, 6   ;;  %s1354_s13 = sld [smem:[#allocation14_spill]] }
 0x205   : > { %s1355_s27 = sld [smem:[#allocation15_spill]]  ;;  %s1356_s21 = smov %s1030_s22 }
 0x206   : > { %s1357_s22 = smov %s1034_s23  ;;  %s1358_s23 = smov %s1188_s18 }
 0x207   : > { %s1359_s24 = smov %s1046_s26  ;;  %24 = sbr.rel (!%p22_p3) target bundleno = 11 (0xb), region = 105 }
 0x20a   : > { %s1360_s26 = smov %s1354_s13 }
 0x20c   :  { %648 = vsyncpa [#allocation4], 1 }
 0x20d   :  { %650 = vsyncpa [#allocation4 + $0x1], 1 }
 0x20e   :  { %651 = vsyncpa [#allocation7], 1 }
 0x20f   :  { %653 = vsyncpa [#allocation7 + $0x1], 1 }
 0x210   :  { %654 = vsyncpa [#allocation5], 1 }
 0x211   :  { %656 = vsyncpa [#allocation5 + $0x1], 1 }

</bundles_post_ra>
